<compile_context>
chip_gen: v7x
topology: tpu7x:2x2x1
jax: 0.10.0
libtpu: 0.0.40
codegen_flags: <defaults>
</compile_context>

<pallas_src>
import functools

import jax
import jax.numpy as jnp
from jax.experimental import pallas as pl
from jax.experimental.pallas import tpu as pltpu


# ---------------------------------------------------------------------------
# Kernels
# ---------------------------------------------------------------------------
def _proj_kernel(x_ref, w_ref, h_ref, *, ones_col):
    # x_ref: (tm_p, F_in), w_ref: (F_in, F_pad), h_ref: (tm_p, F_pad)
    h = jnp.dot(x_ref[...], w_ref[...], preferred_element_type=jnp.float32)
    # Inject the "ones" column used by the aggregation kernel to get the
    # adjacency row-sum out of the MXU for free.
    lane = jax.lax.broadcasted_iota(jnp.int32, h.shape, 1)
    h_ref[...] = jnp.where(lane == ones_col, jnp.float32(1.0), h).astype(h_ref.dtype)


def _agg_kernel(adj_ref, h_ref, b_ref, o_ref, acc_ref, *, ones_col):
    # adj_ref: (1, tm, tk), h_ref: (1, tk, F_pad), b_ref: (1, F_pad)
    # o_ref:  (1, tm, F_pad), acc_ref: (tm, F_pad) f32 scratch
    k = pl.program_id(2)

    @pl.when(k == 0)
    def _():
        acc_ref[...] = jnp.zeros_like(acc_ref)

    # Pure-MXU inner loop: accumulate adj-tile @ hidden-tile in f32.
    acc_ref[...] += jnp.dot(adj_ref[0], h_ref[0],
                            preferred_element_type=jnp.float32)

    @pl.when(k == pl.num_programs(2) - 1)
    def _():
        acc = acc_ref[...]
        # Row-sum of adj landed in the `ones_col` lane of the accumulator.
        lane = jax.lax.broadcasted_iota(jnp.int32, acc.shape, 1)
        denom = jnp.sum(jnp.where(lane == ones_col, acc, 0.0),
                        axis=1, keepdims=True) + 1.0
        inv = pl.reciprocal(denom, approx=False)       # exact; epilogue-only
        o_ref[0] = (acc * inv + b_ref[...]).astype(o_ref.dtype)


# ---------------------------------------------------------------------------
# Wrapper
# ---------------------------------------------------------------------------
def _round_up(x, m):
    return (x + m - 1) // m * m


def _pick_row_tile(total):
    for c in (512, 256, 128, 64, 32, 16, 8):
        if c <= total and total % c == 0:
            return c
    return total


def graph_convolution(text, adj, weight, bias=None):
    """Pallas TPU implementation of GraphConvolution.forward.

    text:   (B, N, F_in)   adj: (B, N, N)   weight: (F_in, F_out)
    bias:   (F_out,) or None
    returns (B, N, F_out) float32  (matches torch, which upcasts text to f32)
    """
    B, N, F_in = text.shape
    F_out = weight.shape[1]

    # --- padding / tiling decisions ---------------------------------------
    # Lane-dense output (+1 extra lane for the adj row-sum column).
    F_pad = _round_up(F_out + 1, 128)
    ones_col = F_out

    if N <= 256:
        N_pad = _round_up(N, 8)
        tm = tk = N_pad                    # single node tile, full-dim blocks
    else:
        N_pad = _round_up(N, 256)
        tm = tk = 256                      # 128-aligned tiles (v5e/v6e/v7x)

    if N_pad != N:
        # Zero padding: padded neighbor columns contribute 0 to both the
        # aggregation and the row-sum; padded rows are sliced off below.
        text = jnp.pad(text, ((0, 0), (0, N_pad - N), (0, 0)))
        adj = jnp.pad(adj, ((0, 0), (0, N_pad - N), (0, N_pad - N)))

    w_pad = jnp.zeros((F_in, F_pad), weight.dtype).at[:, :F_out].set(weight)
    if bias is not None:
        b_pad = jnp.zeros((1, F_pad), jnp.float32).at[0, :F_out].set(
            bias.astype(jnp.float32))
    else:
        b_pad = jnp.zeros((1, F_pad), jnp.float32)   # zero bias == no-op

    # --- kernel 1: hidden = text @ W  (batch folded into M) ----------------
    M_rows = B * N_pad
    text2d = text.reshape(M_rows, F_in)
    tm_p = _pick_row_tile(M_rows)

    proj_cost = pl.CostEstimate(
        flops=int(2 * M_rows * F_in * F_pad),
        transcendentals=0,
        bytes_accessed=int(text2d.size * text2d.dtype.itemsize
                           + w_pad.size * w_pad.dtype.itemsize
                           + M_rows * F_pad * 4),
    )
    hidden2d = pl.pallas_call(
        functools.partial(_proj_kernel, ones_col=ones_col),
        out_shape=jax.ShapeDtypeStruct((M_rows, F_pad), jnp.float32),
        grid_spec=pltpu.PrefetchScalarGridSpec(
            num_scalar_prefetch=0,
            grid=(M_rows // tm_p,),
            in_specs=[
                pl.BlockSpec((tm_p, F_in), lambda i: (i, 0)),
                pl.BlockSpec((F_in, F_pad), lambda i: (0, 0)),
            ],
            out_specs=pl.BlockSpec((tm_p, F_pad), lambda i: (i, 0)),
        ),
        compiler_params=pltpu.CompilerParams(
            dimension_semantics=("parallel",)),
        cost_estimate=proj_cost,
    )(text2d, w_pad)
    hidden = hidden2d.reshape(B, N_pad, F_pad)

    # --- kernel 2: out = (adj @ hidden_aug) / denom + bias -----------------
    mt, kt = N_pad // tm, N_pad // tk
    agg_cost = pl.CostEstimate(
        flops=int(2 * B * N_pad * N_pad * F_pad),
        transcendentals=int(B * N_pad),
        bytes_accessed=int(adj.size * adj.dtype.itemsize
                           + hidden.size * 4
                           + b_pad.size * 4
                           + B * N_pad * F_pad * 4),
    )
    out_pad = pl.pallas_call(
        functools.partial(_agg_kernel, ones_col=ones_col),
        out_shape=jax.ShapeDtypeStruct((B, N_pad, F_pad), jnp.float32),
        grid_spec=pltpu.PrefetchScalarGridSpec(
            num_scalar_prefetch=0,
            grid=(B, mt, kt),
            in_specs=[
                pl.BlockSpec((1, tm, tk), lambda b, m, k: (b, m, k)),
                pl.BlockSpec((1, tk, F_pad), lambda b, m, k: (b, k, 0)),
                pl.BlockSpec((1, F_pad), lambda b, m, k: (0, 0)),
            ],
            out_specs=pl.BlockSpec((1, tm, F_pad), lambda b, m, k: (b, m, 0)),
            scratch_shapes=[pltpu.VMEM((tm, F_pad), jnp.float32)],
        ),
        compiler_params=pltpu.CompilerParams(
            dimension_semantics=("parallel", "parallel", "arbitrary")),
        cost_estimate=agg_cost,
    )(adj, hidden, b_pad)

    return out_pad[:, :N, :F_out]


# ---------------------------------------------------------------------------
# Reference & test
# ---------------------------------------------------------------------------
def reference(text, adj, weight, bias):
    text = text.astype(jnp.float32)
    hidden = jnp.matmul(text, weight)
    denom = jnp.sum(adj, axis=2, keepdims=True) + 1.0
    output = jnp.matmul(adj, hidden) / denom
    return output + bias if bias is not None else output


if __name__ == "__main__":
    key = jax.random.PRNGKey(0)

    # ---- small test: shapes consistent with the module's forward ----------
    B, N, F_in, F_out = 2, 8, 32, 16
    k1, k2, k3, k4 = jax.random.split(key, 4)
    text = jax.random.normal(k1, (B, N, F_in), dtype=jnp.float32)
    adj = jax.random.uniform(k2, (B, N, N), dtype=jnp.float32)
    weight = jax.random.normal(k3, (F_in, F_out), dtype=jnp.float32) * 0.1
    bias = jax.random.normal(k4, (F_out,), dtype=jnp.float32) * 0.1

    out = jax.block_until_ready(graph_convolution(text, adj, weight, bias))
    ref = reference(text, adj, weight, bias)
    assert out.shape == (B, N, F_out)
    assert jnp.allclose(out, ref, atol=1e-4, rtol=1e-4), "mismatch vs reference"

    # no-bias path
    out_nb = jax.block_until_ready(graph_convolution(text, adj, weight, None))
    ref_nb = reference(text, adj, weight, None)
    assert jnp.allclose(out_nb, ref_nb, atol=1e-4, rtol=1e-4), "no-bias mismatch"

    # ---- slightly larger test: exercises padding + M/K tiling -------------
    B2, N2, Fi2, Fo2 = 1, 300, 48, 20
    k5, k6, k7, k8 = jax.random.split(jax.random.PRNGKey(1), 4)
    text2 = jax.random.normal(k5, (B2, N2, Fi2), dtype=jnp.float32)
    adj2 = jax.random.uniform(k6, (B2, N2, N2), dtype=jnp.float32)
    w2 = jax.random.normal(k7, (Fi2, Fo2), dtype=jnp.float32) * 0.1
    b2 = jax.random.normal(k8, (Fo2,), dtype=jnp.float32) * 0.1

    out2 = jax.block_until_ready(graph_convolution(text2, adj2, w2, b2))
    ref2 = reference(text2, adj2, w2, b2)
    assert out2.shape == (B2, N2, Fo2)
    # Looser tolerance: tiled accumulation order / default MXU precision differ
    # slightly from the XLA reference matmul at larger reduction lengths.
    assert jnp.allclose(out2, ref2, atol=2e-3, rtol=2e-3), "tiled-path mismatch"

    print("KERNEL_OK")
</pallas_src>

<mosaic_0001>
module attributes {stable_mosaic.version = 11 : i64} {
  func.func @_proj_kernel(%arg0: i32, %arg1: memref<16x32xf32, #tpu.memory_space<vmem>>, %arg2: memref<32x128xf32, #tpu.memory_space<vmem>>, %arg3: memref<16x128xf32, #tpu.memory_space<vmem>>) attributes {dimension_semantics = [#tpu.dimension_semantics<parallel>], iteration_bounds = array<i64: 1>, scalar_prefetch = 0 : i64, scratch_operands = 0 : i64, tpu.core_type = #tpu.core_type<tc>, window_params = [{transform_indices = @transform_0, window_bounds = array<i64: 16, 32>}, {pipeline_mode = #tpu.pipeline_mode<synchronous>, transform_indices = @transform_1, window_bounds = array<i64: 32, 128>}, {transform_indices = @transform_2, window_bounds = array<i64: 16, 128>}]} {
    %c0 = arith.constant 0 : index
    %c0_0 = arith.constant 0 : index
    %0 = vector.load %arg1[%c0, %c0_0] : memref<16x32xf32, #tpu.memory_space<vmem>>, vector<16x32xf32>
    %c0_1 = arith.constant 0 : index
    %c0_2 = arith.constant 0 : index
    %1 = vector.load %arg2[%c0_1, %c0_2] : memref<32x128xf32, #tpu.memory_space<vmem>>, vector<32x128xf32>
    %cst = arith.constant dense<0.000000e+00> : vector<16x128xf32>
    %2 = tpu.matmul %0, %1, %cst {dimension_numbers = #tpu.dot_dimension_numbers<[1], [0], [0], [1], [0, 0, 1, 1], [], []>} : vector<16x32xf32>, vector<32x128xf32>, vector<16x128xf32> -> vector<16x128xf32>
    %3 = tpu.iota {dimensions = array<i32: 1>} : vector<16x128xi32>
    %c16_i32 = arith.constant 16 : i32
    %4 = vector.broadcast %c16_i32 : i32 to vector<16x128xi32>
    %5 = arith.cmpi eq, %3, %4 : vector<16x128xi32>
    %cst_3 = arith.constant 1.000000e+00 : f32
    %6 = vector.broadcast %cst_3 : f32 to vector<16x128xf32>
    %7 = arith.select %5, %6, %2 : vector<16x128xi1>, vector<16x128xf32>
    %c0_4 = arith.constant 0 : index
    %c0_5 = arith.constant 0 : index
    %8 = vector.load %arg3[%c0_4, %c0_5] : memref<16x128xf32, #tpu.memory_space<vmem>>, vector<16x128xf32>
    tpu.vector_store %arg3[%c0_4, %c0_5], %7 {strides = array<i32>} : memref<16x128xf32, #tpu.memory_space<vmem>>, vector<16x128xf32>,
    return
  }
  func.func @transform_0(%arg0: i32) -> (i32, i32) {
    %c0_i32 = arith.constant 0 : i32
    %c0_i32_0 = arith.constant 0 : i32
    return %arg0, %c0_i32 : i32, i32
  }
  func.func @transform_1(%arg0: i32) -> (i32, i32) {
    %c0_i32 = arith.constant 0 : i32
    %c0_i32_0 = arith.constant 0 : i32
    %c0_i32_1 = arith.constant 0 : i32
    return %c0_i32, %c0_i32_0 : i32, i32
  }
  func.func @transform_2(%arg0: i32) -> (i32, i32) {
    %c0_i32 = arith.constant 0 : i32
    %c0_i32_0 = arith.constant 0 : i32
    return %arg0, %c0_i32 : i32, i32
  }
}

</mosaic_0001>

<bundles_post_ra>
// kernel: tpu_custom_call.1
= control target key start
LH: loop header
LB: loop body
LE: loop exit
PB: predicated region body
PF: predicated region fallthrough
CT: control target
= control target key end

     0   :  { %7 = vsyncpa [#allocation3], 0  ;;  %s322_s0 = inlined_call_operand.hbm [shape: f32[16,32], index: 0, kind: input, shape index: {}]   ;;  %s323_s1 = inlined_call_operand.hbm [shape: f32[32,128], index: 1, kind: input, shape index: {}]   ;;  %s324_s2 = inlined_call_operand.hbm [shape: f32[16,128], index: 2, kind: output, shape index: {}]  }
   0x1   :  { %8 = vsyncpa [#allocation6], 0 }
   0x2   :  { %9 = vsyncpa [#allocation4], 0  ;;  %s257_s9 = smov [#allocation2]   ;;  %s185_s13 = scalar_lea.hbm %s322_s0, 256 }
   0x3   :  { %s15_s10 = sshll.u32 %s257_s9, 4  ;;  %p186_p0 = scmp.ne.s32.totalorder %s322_s0, %s185_s13  ;;  %s16_s10 = int_to_ptr.vmem [resolvable:$true] %s15_s10 }
   0x4   :  { %p189_p1 = scmp.lt.u32.totalorder %s185_s13, %s322_s0 }
   0x6   :  { %p191_p2 = pnand %p189_p1, %p186_p0 }
   0x8   :  { %194 = shalt.err (!%p191_p2)
}
   0x9   :  { %s195_s18 = scalar_lea.vmem %s16_s10, 256  ;;  %p200_p4 = scmp.lt.s32.totalorder %s16_s10, %s16_s10 }
   0xa   :  { %p196_p3 = scmp.ne.s32.totalorder %s16_s10, %s195_s18  ;;  %p201_p5 = scmp.lt.s32.totalorder %s195_s18, %s195_s18 }
   0xc   :  { %p202_p6 = por %p201_p5, %p200_p4 }
   0xe   :  { %p203_p7 = pnand %p202_p6, %p196_p3 }
  0x10   :  { %206 = shalt.err (!%p203_p7)
}
  0x11   :  { %s258_s19 = smov 128   ;;  %s259_s20 = smov 8  }
  0x12   :  { %21 = dma.hbm_to_vmem [thread:$0]  %s322_s0, 256, %s16_s10, [#allocation3], %s258_s19, %s258_s19, %s259_s20  }
  0x13   :  { %s260_s23 = smov [#allocation5]   ;;  %s207_s27 = scalar_lea.hbm %s323_s1, 512 }
  0x14   :  { %s27_s24 = sshll.u32 %s260_s23, 4  ;;  %p208_p8 = scmp.ne.s32.totalorder %s323_s1, %s207_s27  ;;  %s28_s24 = int_to_ptr.vmem [resolvable:$true] %s27_s24 }
  0x15   :  { %p211_p9 = scmp.lt.u32.totalorder %s207_s27, %s323_s1 }
  0x17   :  { %p213_p10 = pnand %p211_p9, %p208_p8 }
  0x19   :  { %216 = shalt.err (!%p213_p10)
}
  0x1a   :  { %s217_s4 = scalar_lea.vmem %s28_s24, 512  ;;  %p222_p12 = scmp.lt.s32.totalorder %s28_s24, %s28_s24 }
  0x1b   :  { %p218_p11 = scmp.ne.s32.totalorder %s28_s24, %s217_s4  ;;  %p223_p13 = scmp.lt.s32.totalorder %s217_s4, %s217_s4 }
  0x1d   :  { %p224_p0 = por %p223_p13, %p222_p12 }
  0x1f   :  { %p225_p1 = pnand %p224_p0, %p218_p11 }
  0x21   :  { %228 = shalt.err (!%p225_p1)
}
  0x22   :  { %33 = dma.hbm_to_vmem [thread:$0]  %s323_s1, 512, %s28_s24, [#allocation6], %s258_s19, %s258_s19, %s259_s20  }
  0x23   :  { %251 = dma.done.wait [#allocation3], 256  }
  0x24   :  { %252 = vsyncadd [#allocation3], 4294967040 }
  0x25   :  { %253 = dma.done.wait [#allocation6], 512  }
  0x26   :  { %254 = vsyncadd [#allocation6], 4294966784  ;;  %vm46_vm0 = vcmask 261120   ;;  %v42_v0 = vld [vmem:[#allocation5] sm:$0xff]  ;;  %v43_v1 = vld [vmem:[#allocation5 + $0x8] sm:$0xff]  ;;  %v128_v8 = vlaneseq  ;;  %s261_s1 = smov [#allocation7]  }
  0x27   :  { %v44_v2 = vld [vmem:[#allocation5 + $0x10] sm:$0xff]  ;;  %v172_v3 = vpack.c.bf16 %v43_v1, %v42_v0  ;;  %v45_v4 = vld [vmem:[#allocation5 + $0x18] sm:$0xff]  ;;  %s140_s6 = sshll.u32 %s261_s1, 4  ;;  %s141_s6 = int_to_ptr.vmem [resolvable:$true] %s140_s6 }
  0x28   :  { %v40_v5 = vld [vmem:[#allocation2] sm:$0xff]  ;;  %v176_v6 = vpack.c.bf16 %v45_v4, %v44_v2  ;;  %v41_v7 = vld [vmem:[#allocation2 + $0x8] sm:$0xff]  ;;  %v129_v9 = vand.u32 127, %v128_v8  ;;  %s229_s7 = scalar_lea.vmem %s141_s6, 256  ;;  %p234_p3 = scmp.lt.s32.totalorder %s141_s6, %s141_s6 }
  0x29   :  { %169 = vmatprep.mubr.msk.f32.mxu0 %vm46_vm0, %v40_v5  ;;  %173 = vmatprep.subr.bf16.mxu0 %v172_v3  ;;  %p230_p2 = scmp.ne.s32.totalorder %s141_s6, %s229_s7  ;;  %p235_p4 = scmp.lt.s32.totalorder %s229_s7, %s229_s7 }
  0x2a   :  { %175 = vmatpush3.bf16.msra.mxu0 %v172_v3  ;;  %vm130_vm1 = vcmp.eq.s32.totalorder %v129_v9, 16 }
  0x2b   :  { %177 = vmatprep.subr.bf16.mxu0 %v176_v6  ;;  %p236_p5 = por %p235_p4, %p234_p3 }
  0x2d   :  { %p237_p6 = pnand %p236_p5, %p230_p2 }
  0x2e   :  { %179 = vmatpush3.bf16.msra.mxu0 %v176_v6 }
  0x31   :  { %170 = vmatmul.mubr.msk.f32.vlgmr.msra.gmra.mrb[0].mxu0 %vm46_vm0, %v41_v7 }
 0x104   :  { %v171_v10 = vpop.f32.mrb[0].mxu0 }
 0x105   :  { %v132_v11 = vsel %vm130_vm1, 1.0, %v171_v10  ;;  %v119_v12 = vpop.f32.mrb[1].mxu0 }
 0x106   :  { %134 = vst [vmem:[#allocation7 + $0x8] sm:$0xff] %v132_v11  ;;  %v131_v13 = vsel %vm130_vm1, 1.0, %v119_v12 }
 0x107   :  { %133 = vst [vmem:[#allocation7] sm:$0xff] %v131_v13 }
 0x108   :  { %240 = shalt.err (!%p237_p6)
}
 0x109   :  { %s241_s10 = scalar_lea.hbm %s324_s2, 256 }
 0x10a   :  { %p242_p7 = scmp.ne.s32.totalorder %s324_s2, %s241_s10  ;;  %p245_p8 = scmp.lt.u32.totalorder %s241_s10, %s324_s2 }
 0x10c   :  { %p247_p9 = pnand %p245_p8, %p242_p7 }
 0x10e   :  { %250 = shalt.err (!%p247_p9)
}
 0x10f   :  { %146 = dma.vmem_to_hbm [thread:$0]  %s141_s6, 256, %s324_s2, [#allocation4], %s258_s19, %s258_s19, %s259_s20  }
 0x110   :  { %255 = dma.done.wait [#allocation4], 256  }
 0x111   :  { %256 = vsyncadd [#allocation4], 4294967040 }
 0x112   :  { %150 = vsyncpa [#allocation3], 1 }
 0x113   :  { %151 = vsyncpa [#allocation6], 1 }
 0x114   :  { %152 = vsyncpa [#allocation4], 1 }

</bundles_post_ra>
